<compile_context>
chip_gen: v6e
topology: v6e:2x2x1
jax: 0.10.0
libtpu: 0.0.40
codegen_flags: <defaults>
</compile_context>

<pallas_src>
import functools

import numpy as np
import jax
import jax.numpy as jnp
from jax.experimental import pallas as pl
from jax.experimental.pallas import tpu as pltpu


def _round_up(n, m):
    return ((n + m - 1) // m) * m


def _cdiv(a, b):
    return (a + b - 1) // b


# ----------------------------------------------------------------------------
# Fused Pallas kernel: all hidden masked-linears (+ReLU) and the stacked output
# head in one body.  Weights are already masked, transposed to [in, out], and
# zero-padded to lane-dense shapes.  refs = (w0, b0, w1, b1, ..., V, c, o_ref).
# ----------------------------------------------------------------------------
def _made_fused_kernel(x_ref, *refs, num_layers):
    o_ref = refs[-1]
    h = x_ref[...]                                              # [Bt, D_in] f32
    for i in range(num_layers):
        w = refs[2 * i][...]                                    # [in, H_PAD]
        b = refs[2 * i + 1][...]                                # [1, H_PAD]
        h = jnp.dot(h, w, preferred_element_type=jnp.float32) + b
        h = jnp.maximum(h, 0.0)                                 # ReLU
    v = refs[2 * num_layers][...]                               # [H_PAD, OUT_PAD]
    c = refs[2 * num_layers + 1][...]                           # [1, OUT_PAD]
    y = jnp.dot(h, v, preferred_element_type=jnp.float32) + c
    o_ref[...] = y.astype(o_ref.dtype)


# ----------------------------------------------------------------------------
# Mask construction (faithful port of create_mask / sample_mask_indices).
# ----------------------------------------------------------------------------
def sample_mask_indices(D, H, rng):
    mk = np.linspace(0, D - 1, H)
    ints = np.array(mk, dtype=int)
    ints += rng.rand() < mk - ints
    return ints


def create_mask(D_observed, D_latent, H, num_layers, rng):
    m_input = np.concatenate((np.zeros(D_observed), 1 + np.arange(D_latent)))
    m_w = [sample_mask_indices(D_latent, H, rng) for _ in range(num_layers)]
    m_v = np.arange(D_latent)
    M_A = 1.0 * (np.atleast_2d(m_v).T >= np.atleast_2d(m_input))
    M_W = [1.0 * (np.atleast_2d(m_w[0]).T >= np.atleast_2d(m_input))]
    for i in range(1, num_layers):
        M_W.append(1.0 * (np.atleast_2d(m_w[i]).T >= np.atleast_2d(m_w[i - 1])))
    M_V = 1.0 * (np.atleast_2d(m_v).T >= np.atleast_2d(m_w[-1]))
    return M_W, M_V, M_A


# ----------------------------------------------------------------------------
# Module: deterministic parameter init (uniform(-0.01,0.01) weights,
# normal(std=0.01) biases).  Forward = jitted (pad -> fused Pallas -> reshape).
# ----------------------------------------------------------------------------
class ConditionalRealValueMADE:
    LANE = 128            # vreg lane width: hidden/output dims padded to this
    MAX_B_TILE = 2048     # batch tile cap (a few MiB of VMEM, far under limits)
    SPLIT_B = 1024        # for B >= this, force >= 2 grid steps (v7x megacore)

    def __init__(self, D_observed, D_latent, H, num_layers,
                 n_params_per_flow, key):
        assert num_layers >= 1
        self.D_in = D_observed + D_latent
        self.D_out = D_latent
        self.H = H
        self.num_layers = num_layers
        self.n_flows = D_latent            # len(flows) == D_latent (module assert)
        self.n_params = n_params_per_flow  # e.g. (alpha, mu, sigma)
        self.OUT = self.n_flows * self.n_params * D_latent

        # Masks are deterministic (RandomState(0)), matching the numpy mask recipe.
        np_rng = np.random.RandomState(0)
        M_W, M_V, _ = create_mask(D_observed, D_latent, H, num_layers, np_rng)
        self.M_W = [jnp.asarray(M, dtype=jnp.float32) for M in M_W]
        self.M_V = jnp.asarray(M_V, dtype=jnp.float32)

        def uniform(k, shape):
            return jax.random.uniform(k, shape, jnp.float32, -0.01, 0.01)

        def normal(k, shape):
            return 0.01 * jax.random.normal(k, shape, jnp.float32)

        keys = jax.random.split(
            key, 2 * num_layers + 2 * self.n_flows * self.n_params)
        ki = 0

        # Raw (PyTorch-layout [out,in]) parameters, kept for the pure-JAX reference.
        self.layer_weights, self.layer_biases = [], []
        in_feat = self.D_in
        for _ in range(num_layers):
            self.layer_weights.append(uniform(keys[ki], (H, in_feat))); ki += 1
            self.layer_biases.append(normal(keys[ki], (H,))); ki += 1
            in_feat = H

        v_ws, v_bs = [], []
        for _j in range(self.n_flows):
            for _k in range(self.n_params):
                v_ws.append(uniform(keys[ki], (D_latent, H))); ki += 1
                v_bs.append(normal(keys[ki], (D_latent,))); ki += 1
        self.V_stacked = jnp.concatenate(v_ws, axis=0)                  # [OUT, H]
        self.c_stacked = jnp.concatenate(v_bs, axis=0)                  # [OUT]
        self.MV_tiled = jnp.tile(self.M_V, (self.n_flows * self.n_params, 1))

        # ---- Kernel-side parameters: masks folded in (valid while frozen),
        # ---- transposed to [in, out], zero-padded to lane-dense shapes.
        # ---- The input dim is NOT padded: layer-0 weight keeps D_in real rows.
        self.H_PAD = _round_up(H, self.LANE)
        self.OUT_PAD = _round_up(self.OUT, self.LANE)

        def pad2(a, rows, cols):
            out = jnp.zeros((rows, cols), jnp.float32)
            return out.at[:a.shape[0], :a.shape[1]].set(a)

        self.kw, self.kb = [], []
        in_rows = self.D_in
        for w, m, b in zip(self.layer_weights, self.M_W, self.layer_biases):
            wt = (w * m).T                                              # [in, H]
            self.kw.append(pad2(wt, in_rows, self.H_PAD))
            self.kb.append(pad2(b.reshape(1, -1), 1, self.H_PAD))
            in_rows = self.H_PAD
        self.kv = pad2((self.V_stacked * self.MV_tiled).T, self.H_PAD, self.OUT_PAD)
        self.kc = pad2(self.c_stacked.reshape(1, -1), 1, self.OUT_PAD)

        # One jitted end-to-end forward (pad + pallas_call + slice + reshape fused).
        self._forward_jit = jax.jit(self._forward_core)

    # ---------------------- jitted core: stacked output -----------------------
    def _forward_core(self, x):
        B = x.shape[0]

        # Balanced batch tiling: avoid ~2x zero-row padding just above a tile
        # boundary, and give v7x's two TensorCores >= 2 grid steps at large B.
        n_tiles = _cdiv(B, self.MAX_B_TILE)
        if B >= self.SPLIT_B and n_tiles < 2:
            n_tiles = 2
        b_tile = _round_up(_cdiv(B, n_tiles), 8)
        b_pad = n_tiles * b_tile

        x_p = x.astype(jnp.float32)
        if b_pad != B:
            x_p = jnp.pad(x_p, ((0, b_pad - B), (0, 0)))   # rows only; D_in lanes untouched

        # Input block's last dim equals the full array dim (D_in) -> legal and DMA-lean.
        in_specs = [pl.BlockSpec((b_tile, self.D_in), lambda i: (i, 0))]
        operands = [x_p]
        for w, b in zip(self.kw, self.kb):
            in_specs.append(pl.BlockSpec(w.shape, lambda i: (0, 0)))
            in_specs.append(pl.BlockSpec(b.shape, lambda i: (0, 0)))
            operands.extend([w, b])
        in_specs.append(pl.BlockSpec(self.kv.shape, lambda i: (0, 0)))
        in_specs.append(pl.BlockSpec(self.kc.shape, lambda i: (0, 0)))
        operands.extend([self.kv, self.kc])

        out = pl.pallas_call(
            functools.partial(_made_fused_kernel, num_layers=self.num_layers),
            out_shape=jax.ShapeDtypeStruct((b_pad, self.OUT_PAD), jnp.float32),
            grid=(n_tiles,),
            in_specs=in_specs,
            out_specs=pl.BlockSpec((b_tile, self.OUT_PAD), lambda i: (i, 0)),
            compiler_params=pltpu.CompilerParams(
                dimension_semantics=("parallel",),        # megacore on v7x
                vmem_limit_bytes=32 * 1024 * 1024),       # clears v5e's 16 MiB default
        )(*operands)

        # One slice + one reshape (fused under jit) instead of 12 tiny slices.
        return out[:B, :self.OUT].reshape(B, self.n_flows, self.n_params, self.D_out)

    # --------------------------------- API -------------------------------------
    def forward(self, x):
        """Fast path: stacked [B, n_flows, n_params, D_latent] array."""
        return self._forward_jit(x)

    def forward_nested(self, x):
        """Module-parity accessor: nested list flow_params[j][k] -> [B, D_latent]."""
        out = self._forward_jit(x)
        return [[out[:, j, k, :] for k in range(self.n_params)]
                for j in range(self.n_flows)]

    # ---------------------- pure-JAX reference (no Pallas) --------------------
    def forward_ref(self, x):
        h = x
        for w, m, b in zip(self.layer_weights, self.M_W, self.layer_biases):
            h = jnp.maximum(h @ (w * m).T + b, 0.0)
        out = h @ (self.V_stacked * self.MV_tiled).T + self.c_stacked
        return out.reshape(x.shape[0], self.n_flows, self.n_params, self.D_out)

    # TODO(synk): sample()/logpdf()/propose() depend on the flow objects and
    # sequential autoregressive sampling; only forward() is implemented here.


if __name__ == "__main__":
    D_observed, D_latent, H, num_layers = 4, 4, 32, 2
    n_params_per_flow = 3   # synthetic flows: (alpha, mu, sigma)-like heads
    batch = 8

    key = jax.random.PRNGKey(0)
    k_params, k_x = jax.random.split(key)
    made = ConditionalRealValueMADE(D_observed, D_latent, H, num_layers,
                                    n_params_per_flow, k_params)

    x = jax.random.normal(k_x, (batch, D_observed + D_latent), jnp.float32)

    stacked = made.forward(x)               # [B, n_flows, n_params, D_latent]
    jax.block_until_ready(stacked)

    ref = made.forward_ref(x)
    np.testing.assert_allclose(np.asarray(stacked), np.asarray(ref),
                               rtol=1e-5, atol=1e-5)

    # Nested-list accessor matches the original module's forward() layout.
    nested = made.forward_nested(x)
    np.testing.assert_allclose(np.asarray(nested[1][2]),
                               np.asarray(ref[:, 1, 2, :]),
                               rtol=1e-5, atol=1e-5)
    print("KERNEL_OK")
</pallas_src>

<mosaic_0001>
module attributes {stable_mosaic.version = 11 : i64} {
  func.func @_made_fused_kernel(%arg0: i32, %arg1: memref<8x8xf32, #tpu.memory_space<vmem>>, %arg2: memref<8x128xf32, #tpu.memory_space<vmem>>, %arg3: memref<1x128xf32, #tpu.memory_space<vmem>>, %arg4: memref<128x128xf32, #tpu.memory_space<vmem>>, %arg5: memref<1x128xf32, #tpu.memory_space<vmem>>, %arg6: memref<128x128xf32, #tpu.memory_space<vmem>>, %arg7: memref<1x128xf32, #tpu.memory_space<vmem>>, %arg8: memref<8x128xf32, #tpu.memory_space<vmem>>) attributes {dimension_semantics = [#tpu.dimension_semantics<parallel>], iteration_bounds = array<i64: 1>, scalar_prefetch = 0 : i64, scratch_operands = 0 : i64, tpu.core_type = #tpu.core_type<tc>, window_params = [{transform_indices = @transform_0, window_bounds = array<i64: 8, 8>}, {pipeline_mode = #tpu.pipeline_mode<synchronous>, transform_indices = @transform_1, window_bounds = array<i64: 8, 128>}, {pipeline_mode = #tpu.pipeline_mode<synchronous>, transform_indices = @transform_2, window_bounds = array<i64: 1, 128>}, {pipeline_mode = #tpu.pipeline_mode<synchronous>, transform_indices = @transform_3, window_bounds = array<i64: 128, 128>}, {pipeline_mode = #tpu.pipeline_mode<synchronous>, transform_indices = @transform_4, window_bounds = array<i64: 1, 128>}, {pipeline_mode = #tpu.pipeline_mode<synchronous>, transform_indices = @transform_5, window_bounds = array<i64: 128, 128>}, {pipeline_mode = #tpu.pipeline_mode<synchronous>, transform_indices = @transform_6, window_bounds = array<i64: 1, 128>}, {transform_indices = @transform_7, window_bounds = array<i64: 8, 128>}]} {
    %c0 = arith.constant 0 : index
    %c0_0 = arith.constant 0 : index
    %0 = vector.load %arg1[%c0, %c0_0] : memref<8x8xf32, #tpu.memory_space<vmem>>, vector<8x8xf32>
    %c0_1 = arith.constant 0 : index
    %c0_2 = arith.constant 0 : index
    %1 = vector.load %arg2[%c0_1, %c0_2] : memref<8x128xf32, #tpu.memory_space<vmem>>, vector<8x128xf32>
    %c0_3 = arith.constant 0 : index
    %c0_4 = arith.constant 0 : index
    %2 = vector.load %arg3[%c0_3, %c0_4] : memref<1x128xf32, #tpu.memory_space<vmem>>, vector<1x128xf32>
    %cst = arith.constant dense<0.000000e+00> : vector<8x128xf32>
    %3 = tpu.matmul %0, %1, %cst {dimension_numbers = #tpu.dot_dimension_numbers<[1], [0], [0], [1], [0, 0, 1, 1], [], []>} : vector<8x8xf32>, vector<8x128xf32>, vector<8x128xf32> -> vector<8x128xf32>
    %4 = vector.broadcast %2 : vector<1x128xf32> to vector<8x128xf32>
    %5 = arith.addf %3, %4 : vector<8x128xf32>
    %cst_5 = arith.constant 0.000000e+00 : f32
    %6 = vector.broadcast %cst_5 : f32 to vector<8x128xf32>
    %7 = arith.maximumf %5, %6 : vector<8x128xf32>
    %c0_6 = arith.constant 0 : index
    %c0_7 = arith.constant 0 : index
    %8 = vector.load %arg4[%c0_6, %c0_7] : memref<128x128xf32, #tpu.memory_space<vmem>>, vector<128x128xf32>
    %c0_8 = arith.constant 0 : index
    %c0_9 = arith.constant 0 : index
    %9 = vector.load %arg5[%c0_8, %c0_9] : memref<1x128xf32, #tpu.memory_space<vmem>>, vector<1x128xf32>
    %cst_10 = arith.constant dense<0.000000e+00> : vector<8x128xf32>
    %10 = tpu.matmul %7, %8, %cst_10 {dimension_numbers = #tpu.dot_dimension_numbers<[1], [0], [0], [1], [0, 0, 1, 1], [], []>} : vector<8x128xf32>, vector<128x128xf32>, vector<8x128xf32> -> vector<8x128xf32>
    %11 = vector.broadcast %9 : vector<1x128xf32> to vector<8x128xf32>
    %12 = arith.addf %10, %11 : vector<8x128xf32>
    %cst_11 = arith.constant 0.000000e+00 : f32
    %13 = vector.broadcast %cst_11 : f32 to vector<8x128xf32>
    %14 = arith.maximumf %12, %13 : vector<8x128xf32>
    %c0_12 = arith.constant 0 : index
    %c0_13 = arith.constant 0 : index
    %15 = vector.load %arg6[%c0_12, %c0_13] : memref<128x128xf32, #tpu.memory_space<vmem>>, vector<128x128xf32>
    %c0_14 = arith.constant 0 : index
    %c0_15 = arith.constant 0 : index
    %16 = vector.load %arg7[%c0_14, %c0_15] : memref<1x128xf32, #tpu.memory_space<vmem>>, vector<1x128xf32>
    %cst_16 = arith.constant dense<0.000000e+00> : vector<8x128xf32>
    %17 = tpu.matmul %14, %15, %cst_16 {dimension_numbers = #tpu.dot_dimension_numbers<[1], [0], [0], [1], [0, 0, 1, 1], [], []>} : vector<8x128xf32>, vector<128x128xf32>, vector<8x128xf32> -> vector<8x128xf32>
    %18 = vector.broadcast %16 : vector<1x128xf32> to vector<8x128xf32>
    %19 = arith.addf %17, %18 : vector<8x128xf32>
    %c0_17 = arith.constant 0 : index
    %c0_18 = arith.constant 0 : index
    %20 = vector.load %arg8[%c0_17, %c0_18] : memref<8x128xf32, #tpu.memory_space<vmem>>, vector<8x128xf32>
    tpu.vector_store %arg8[%c0_17, %c0_18], %19 {strides = array<i32>} : memref<8x128xf32, #tpu.memory_space<vmem>>, vector<8x128xf32>,
    return
  }
  func.func @transform_0(%arg0: i32) -> (i32, i32) {
    %c0_i32 = arith.constant 0 : i32
    %c0_i32_0 = arith.constant 0 : i32
    return %arg0, %c0_i32 : i32, i32
  }
  func.func @transform_1(%arg0: i32) -> (i32, i32) {
    %c0_i32 = arith.constant 0 : i32
    %c0_i32_0 = arith.constant 0 : i32
    %c0_i32_1 = arith.constant 0 : i32
    return %c0_i32, %c0_i32_0 : i32, i32
  }
  func.func @transform_2(%arg0: i32) -> (i32, i32) {
    %c0_i32 = arith.constant 0 : i32
    %c0_i32_0 = arith.constant 0 : i32
    %c0_i32_1 = arith.constant 0 : i32
    return %c0_i32, %c0_i32_0 : i32, i32
  }
  func.func @transform_3(%arg0: i32) -> (i32, i32) {
    %c0_i32 = arith.constant 0 : i32
    %c0_i32_0 = arith.constant 0 : i32
    %c0_i32_1 = arith.constant 0 : i32
    return %c0_i32, %c0_i32_0 : i32, i32
  }
  func.func @transform_4(%arg0: i32) -> (i32, i32) {
    %c0_i32 = arith.constant 0 : i32
    %c0_i32_0 = arith.constant 0 : i32
    %c0_i32_1 = arith.constant 0 : i32
    return %c0_i32, %c0_i32_0 : i32, i32
  }
  func.func @transform_5(%arg0: i32) -> (i32, i32) {
    %c0_i32 = arith.constant 0 : i32
    %c0_i32_0 = arith.constant 0 : i32
    %c0_i32_1 = arith.constant 0 : i32
    return %c0_i32, %c0_i32_0 : i32, i32
  }
  func.func @transform_6(%arg0: i32) -> (i32, i32) {
    %c0_i32 = arith.constant 0 : i32
    %c0_i32_0 = arith.constant 0 : i32
    %c0_i32_1 = arith.constant 0 : i32
    return %c0_i32, %c0_i32_0 : i32, i32
  }
  func.func @transform_7(%arg0: i32) -> (i32, i32) {
    %c0_i32 = arith.constant 0 : i32
    %c0_i32_0 = arith.constant 0 : i32
    return %arg0, %c0_i32 : i32, i32
  }
}

</mosaic_0001>

<bundles_post_ra>
// kernel: _forward_core.1
= control target key start
LH: loop header
LB: loop body
LE: loop exit
PB: predicated region body
PF: predicated region fallthrough
CT: control target
= control target key end

     0   :  { %12 = vsyncpa [#allocation3], 0  ;;  %s676_s0 = inlined_call_operand.hbm [shape: f32[8,8], index: 0, kind: input, shape index: {}]   ;;  %s677_s1 = inlined_call_operand.hbm [shape: f32[8,128], index: 1, kind: input, shape index: {}]   ;;  %s678_s2 = inlined_call_operand.vmem [shape: f32[1,128], index: 2, kind: input, shape index: {}]   ;;  %s679_s3 = inlined_call_operand.hbm [shape: f32[128,128], index: 3, kind: input, shape index: {}]   ;;  %s680_s4 = inlined_call_operand.vmem [shape: f32[1,128], index: 4, kind: input, shape index: {}]   ;;  %s681_s5 = inlined_call_operand.hbm [shape: f32[128,128], index: 5, kind: input, shape index: {}]   ;;  %s682_s6 = inlined_call_operand.vmem [shape: f32[1,128], index: 6, kind: input, shape index: {}]   ;;  %s683_s7 = inlined_call_operand.vmem [shape: f32[8,128], index: 7, kind: output, shape index: {}]  }
   0x1   :  { %13 = vsyncpa [#allocation5], 0 }
   0x2   :  { %14 = vsyncpa [#allocation8], 0  ;;  %s565_s24 = smov [#allocation4]   ;;  %s566_s26 = smov [#allocation2]  }
   0x3   :  { %s31_s25 = sshll.u32 %s565_s24, 4  ;;  %s21_s27 = sshll.u32 %s566_s26, 4  ;;  %s32_s25 = int_to_ptr.vmem [resolvable:$true] %s31_s25  ;;  %s22_s27 = int_to_ptr.vmem [resolvable:$true] %s21_s27 }
   0x4   :  { %s487_s28 = scalar_lea.vmem %s32_s25, 128  ;;  %p492_p1 = scmp.lt.s32.totalorder %s32_s25, %s32_s25 }
   0x5   :  { %p488_p0 = scmp.ne.s32.totalorder %s32_s25, %s487_s28  ;;  %p493_p2 = scmp.lt.s32.totalorder %s487_s28, %s487_s28 }
   0x7   :  { %p494_p3 = por %p493_p2, %p492_p1 }
   0x9   :  { %p495_p4 = pnand %p494_p3, %p488_p0 }
   0xb   :  { %498 = shalt.err (!%p495_p4)
}
   0xc   :  { %34 = dma.hbm_to_vmem [thread:$0]  %s677_s1, 128, %s32_s25, [#allocation5]  }
   0xd   :  { %s507_s8 = scalar_lea.vmem %s22_s27, 128  ;;  %p512_p6 = scmp.lt.s32.totalorder %s22_s27, %s22_s27 }
   0xe   :  { %p508_p5 = scmp.ne.s32.totalorder %s22_s27, %s507_s8  ;;  %p513_p7 = scmp.lt.s32.totalorder %s507_s8, %s507_s8 }
  0x10   :  { %p514_p8 = por %p513_p7, %p512_p6 }
  0x12   :  { %p515_p9 = pnand %p514_p8, %p508_p5 }
  0x14   :  { %518 = shalt.err (!%p515_p9)
}
  0x15   :  { %24 = dma.hbm_to_vmem [thread:$0]  %s676_s0, 128, %s22_s27, [#allocation3]  }
  0x16   :  { %s567_s11 = smov [#allocation6]  }
  0x17   :  { %s42_s12 = sshll.u32 %s567_s11, 4  ;;  %s43_s12 = int_to_ptr.vmem [resolvable:$true] %s42_s12 }
  0x18   :  { %s527_s13 = scalar_lea.vmem %s43_s12, 2048  ;;  %p532_p11 = scmp.lt.s32.totalorder %s43_s12, %s43_s12 }
  0x19   :  { %p528_p10 = scmp.ne.s32.totalorder %s43_s12, %s527_s13  ;;  %p533_p12 = scmp.lt.s32.totalorder %s527_s13, %s527_s13 }
  0x1b   :  { %p534_p13 = por %p533_p12, %p532_p11 }
  0x1d   :  { %p535_p0 = pnand %p534_p13, %p528_p10 }
  0x1f   :  { %538 = shalt.err (!%p535_p0)
}
  0x20   :  { %s568_s1 = smov 128   ;;  %s569_s14 = smov 8  }
  0x21   :  { %48 = dma.hbm_to_vmem [thread:$0]  %s679_s3, 2048, %s43_s12, [#allocation5], %s568_s1, %s568_s1, %s569_s14  }
  0x22   :  { %s570_s17 = smov [#allocation7]  }
  0x23   :  { %s56_s18 = sshll.u32 %s570_s17, 4  ;;  %s57_s18 = int_to_ptr.vmem [resolvable:$true] %s56_s18 }
  0x24   :  { %s547_s0 = scalar_lea.vmem %s57_s18, 2048  ;;  %p552_p2 = scmp.lt.s32.totalorder %s57_s18, %s57_s18 }
  0x25   :  { %p548_p1 = scmp.ne.s32.totalorder %s57_s18, %s547_s0  ;;  %p553_p3 = scmp.lt.s32.totalorder %s547_s0, %s547_s0 }
  0x27   :  { %p554_p4 = por %p553_p3, %p552_p2 }
  0x29   :  { %p555_p5 = pnand %p554_p4, %p548_p1 }
  0x2b   :  { %558 = shalt.err (!%p555_p5)
}
  0x2c   :  { %62 = dma.hbm_to_vmem [thread:$0]  %s681_s5, 2048, %s57_s18, [#allocation8], %s568_s1, %s568_s1, %s569_s14  }
  0x2d   :  { %559 = dma.done.wait [#allocation3], 128  }
  0x2e   :  { %560 = vsyncadd [#allocation3], 4294967168 }
  0x2f   :  { %561 = dma.done.wait [#allocation5], 2176  }
  0x30   :  { %562 = vsyncadd [#allocation5], 4294965120 }
  0x31   :  { %563 = dma.done.wait [#allocation8], 2048  }
  0x32   :  { %564 = vsyncadd [#allocation8], 4294965248  ;;  %v571_v0 = vmov 0.0   ;;  %vm572_vm0 = vmmov 0   ;;  %vm86_vm1 = vcmask 64512   ;;  %v78_v1 = vld [vmem:[#allocation4] sm:$0xff] }
  0x33   :  { %396 = vmatprep.subr.mxu0 %v571_v0  ;;  %398 = vmatprep.mubr.msk.f32.mxu0 %vm572_vm0, %v571_v0  ;;  %v77_v2 = vld [vmem:[#allocation2] sm:$0xff]  ;;  %v176_v3 = vld [vmem:[#allocation6 + $0x78] sm:$0xff]  ;;  %v174_v5 = vld [vmem:[#allocation6 + $0x68] sm:$0xff] }
  0x34   :  { %401 = vmatprep.subr.mxu1 %v571_v0  ;;  %433 = vmatprep.mubr.msk.f32.mxu1 %vm572_vm0, %v571_v0  ;;  %v175_v4 = vld [vmem:[#allocation6 + $0x70] sm:$0xff]  ;;  %v173_v6 = vld [vmem:[#allocation6 + $0x60] sm:$0xff]  ;;  %v172_v7 = vld [vmem:[#allocation6 + $0x58] sm:$0xff] }
  0x35   :  { %397 = vmatpush3.msra.mxu0 %v78_v1  ;;  %402 = vmatpush3.msra.mxu1 %v176_v3  ;;  %v171_v8 = vld [vmem:[#allocation6 + $0x50] sm:$0xff]  ;;  %v170_v9 = vld [vmem:[#allocation6 + $0x48] sm:$0xff]  ;;  %v169_v10 = vld [vmem:[#allocation6 + $0x40] sm:$0xff] }
  0x36   :  { %399 = vmatmul.mubr.msk.f32.vlgmr.msra.gmra.mxu0 %vm86_vm1, %v77_v2  ;;  %403 = vmatprep.subr.mxu1 %v571_v0  ;;  %v168_v11 = vld [vmem:[#allocation6 + $0x38] sm:$0xff]  ;;  %v167_v12 = vld [vmem:[#allocation6 + $0x30] sm:$0xff]  ;;  %v166_v13 = vld [vmem:[#allocation6 + $0x28] sm:$0xff] }
  0x37   :  { %404 = vmatpush3.msra.mxu1 %v175_v4  ;;  %436 = vmatprep.subr.mxu0 %v571_v0  ;;  %v165_v14 = vld [vmem:[#allocation6 + $0x20] sm:$0xff]  ;;  %v164_v15 = vld [vmem:[#allocation6 + $0x18] sm:$0xff]  ;;  %v163_v16 = vld [vmem:[#allocation6 + $0x10] sm:$0xff] }
  0x38   :  { %405 = vmatprep.subr.mxu1 %v571_v0  ;;  %468 = vmatprep.mubr.msk.f32.mxu0 %vm572_vm0, %v571_v0  ;;  %v162_v17 = vld [vmem:[#allocation6 + $0x8] sm:$0xff]  ;;  %v161_v18 = vld [vmem:[#allocation6] sm:$0xff]  ;;  %v270_v19 = vld [vmem:[#allocation7 + $0x78] sm:$0xff] }
  0x39   :  { %406 = vmatpush3.msra.mxu1 %v174_v5  ;;  %v269_v20 = vld [vmem:[#allocation7 + $0x70] sm:$0xff]  ;;  %437 = vmatpush3.msra.mxu0 %v270_v19  ;;  %v268_v21 = vld [vmem:[#allocation7 + $0x68] sm:$0xff]  ;;  %v267_v22 = vld [vmem:[#allocation7 + $0x60] sm:$0xff] }
  0x3a   :  { %407 = vmatprep.subr.mxu1 %v571_v0  ;;  %438 = vmatprep.subr.mxu0 %v571_v0  ;;  %v266_v23 = vld [vmem:[#allocation7 + $0x58] sm:$0xff]  ;;  %v265_v24 = vld [vmem:[#allocation7 + $0x50] sm:$0xff]  ;;  %v264_v25 = vld [vmem:[#allocation7 + $0x48] sm:$0xff] }
  0x3b   :  { %408 = vmatpush3.msra.mxu1 %v173_v6  ;;  %439 = vmatpush3.msra.mxu0 %v269_v20  ;;  %v263_v26 = vld [vmem:[#allocation7 + $0x40] sm:$0xff]  ;;  %v262_v27 = vld [vmem:[#allocation7 + $0x38] sm:$0xff]  ;;  %v261_v28 = vld [vmem:[#allocation7 + $0x30] sm:$0xff] }
  0x3c   :  { %409 = vmatprep.subr.mxu1 %v571_v0  ;;  %440 = vmatprep.subr.mxu0 %v571_v0  ;;  %v260_v29 = vld [vmem:[#allocation7 + $0x28] sm:$0xff]  ;;  %v259_v30 = vld [vmem:[#allocation7 + $0x20] sm:$0xff]  ;;  %v258_v31 = vld [vmem:[#allocation7 + $0x18] sm:$0xff] }
  0x3d   :  { %410 = vmatpush3.msra.mxu1 %v172_v7  ;;  %441 = vmatpush3.msra.mxu0 %v268_v21  ;;  %v356_v32 = vld [vmem:[%s678_s2] ss:$0 sm:$0xff]  ;;  %v256_v38 = vld [vmem:[#allocation7 + $0x8] sm:$0xff]  ;;  %v255_v39 = vld [vmem:[#allocation7] sm:$0xff] }
  0x3e   :  { %411 = vmatprep.subr.mxu1 %v571_v0  ;;  %442 = vmatprep.subr.mxu0 %v571_v0  ;;  %v257_v37 = vld [vmem:[#allocation7 + $0x10] sm:$0xff] }
  0x3f   :  { %412 = vmatpush3.msra.mxu1 %v171_v8  ;;  %443 = vmatpush3.msra.mxu0 %v267_v22  ;;  %v358_v40 = vld [vmem:[%s680_s4] ss:$0 sm:$0xff] }
  0x40   :  { %413 = vmatprep.subr.mxu1 %v571_v0  ;;  %444 = vmatprep.subr.mxu0 %v571_v0  ;;  %v359_v45 = vld [vmem:[%s682_s6] ss:$0 sm:$0xff] }
  0x41   :  { %414 = vmatpush3.msra.mxu1 %v170_v9  ;;  %445 = vmatpush3.msra.mxu0 %v266_v23 }
  0x42   :  { %415 = vmatprep.subr.mxu1 %v571_v0  ;;  %446 = vmatprep.subr.mxu0 %v571_v0 }
  0x43   :  { %416 = vmatpush3.msra.mxu1 %v169_v10  ;;  %447 = vmatpush3.msra.mxu0 %v265_v24 }
  0x44   :  { %417 = vmatprep.subr.mxu1 %v571_v0  ;;  %448 = vmatprep.subr.mxu0 %v571_v0 }
  0x45   :  { %418 = vmatpush3.msra.mxu1 %v168_v11  ;;  %449 = vmatpush3.msra.mxu0 %v264_v25 }
  0x46   :  { %419 = vmatprep.subr.mxu1 %v571_v0  ;;  %450 = vmatprep.subr.mxu0 %v571_v0 }
  0x47   :  { %420 = vmatpush3.msra.mxu1 %v167_v12  ;;  %451 = vmatpush3.msra.mxu0 %v263_v26 }
  0x48   :  { %421 = vmatprep.subr.mxu1 %v571_v0  ;;  %452 = vmatprep.subr.mxu0 %v571_v0 }
  0x49   :  { %422 = vmatpush3.msra.mxu1 %v166_v13  ;;  %453 = vmatpush3.msra.mxu0 %v262_v27 }
  0x4a   :  { %423 = vmatprep.subr.mxu1 %v571_v0  ;;  %454 = vmatprep.subr.mxu0 %v571_v0 }
  0x4b   :  { %424 = vmatpush3.msra.mxu1 %v165_v14  ;;  %455 = vmatpush3.msra.mxu0 %v261_v28 }
  0x4c   :  { %425 = vmatprep.subr.mxu1 %v571_v0  ;;  %456 = vmatprep.subr.mxu0 %v571_v0 }
  0x4d   :  { %426 = vmatpush3.msra.mxu1 %v164_v15  ;;  %457 = vmatpush3.msra.mxu0 %v260_v29 }
  0x4e   :  { %427 = vmatprep.subr.mxu1 %v571_v0  ;;  %458 = vmatprep.subr.mxu0 %v571_v0 }
  0x4f   :  { %428 = vmatpush3.msra.mxu1 %v163_v16  ;;  %459 = vmatpush3.msra.mxu0 %v259_v30 }
  0x50   :  { %429 = vmatprep.subr.mxu1 %v571_v0  ;;  %460 = vmatprep.subr.mxu0 %v571_v0 }
  0x51   :  { %430 = vmatpush3.msra.mxu1 %v162_v17  ;;  %461 = vmatpush3.msra.mxu0 %v258_v31 }
  0x52   :  { %431 = vmatprep.subr.mxu1 %v571_v0  ;;  %462 = vmatprep.subr.mxu0 %v571_v0 }
  0x53   :  { %432 = vmatpush3.msra.mxu1 %v161_v18  ;;  %463 = vmatpush3.msra.mxu0 %v257_v37 }
  0x54   :  { %464 = vmatprep.subr.mxu0 %v571_v0 }
  0x55   :  { %465 = vmatpush3.msra.mxu0 %v256_v38 }
  0x56   :  { %466 = vmatprep.subr.mxu0 %v571_v0 }
  0x57   :  { %467 = vmatpush3.msra.mxu0 %v255_v39 }
  0xf6   :  { %v156_v33 = vpop.f32.mrf.mxu0 }
  0xf7   :  { %v157_v34 = vadd.f32 %v356_v32, %v156_v33 }
  0xf8   :  { %v400_v35 = vpop.f32.mrf.mxu0 }
  0xf9   :  { %v160_v36 = vmax.f32 %v157_v34, 0.0 }
  0xfb   :  { %434 = vmatmul.mubr.f32.vlgmr.msra.gmra.mxu1 %v160_v36 }
 0x1bb   :  { %v250_v41 = vpop.f32.mrf.mxu1 }
 0x1bc   :  { %v251_v42 = vadd.f32 %v358_v40, %v250_v41 }
 0x1bd   :  { %v435_v43 = vpop.f32.mrf.mxu1 }
 0x1be   :  { %v254_v44 = vmax.f32 %v251_v42, 0.0 }
 0x1c0   :  { %469 = vmatmul.mubr.f32.vlgmr.msra.gmra.mxu0 %v254_v44 }
 0x280   :  { %v344_v46 = vpop.f32.mrf.mxu0 }
 0x281   :  { %v345_v47 = vadd.f32 %v359_v45, %v344_v46 }
 0x282   :  { %v470_v48 = vpop.f32.mrf.mxu0 }
 0x283   :  { %348 = vst [vmem:[%s683_s7] sm:$0xff] %v345_v47 }
 0x284   :  { %353 = vsyncpa [#allocation3], 1 }
 0x285   :  { %354 = vsyncpa [#allocation5], 1 }
 0x286   :  { %355 = vsyncpa [#allocation8], 1 }

</bundles_post_ra>
